<compile_context>
chip_gen: v7x
topology: tpu7x:2x2x1
jax: 0.10.0
libtpu: 0.0.40
codegen_flags: <defaults>
</compile_context>

<pallas_src>
import functools

import jax
import jax.numpy as jnp
from jax.experimental import pallas as pl
from jax.experimental.pallas import tpu as pltpu

IMAGE_SIZE = 784
LEAKY_SLOPE = 0.01            # PyTorch nn.LeakyReLU default negative_slope
F_PAD = 896                   # 784 rounded up to a multiple of 128 (lane-dense)
ENC_DIM = 10
ENC_PAD = 128                 # encoder output written into a lane-dense 128-wide slab


def _round_up(n, m):
    return ((n + m - 1) // m) * m


def _leaky_relu(v):
    return jnp.where(v > 0, v, LEAKY_SLOPE * v)


def autoencoder_kernel(x_ref,
                       w1, b1, w2, b2, w3p, b3p,      # encoder params (w3/b3 padded to 128 cols)
                       w34, b34, w5, b5, w6p, b6p,    # decoder params (first layer fused; w6/b6 padded)
                       enc_ref, dec_ref):
    cd = w1.dtype   # MXU input dtype (bf16 by default); accumulation is always f32

    x = x_ref[...]                                                        # (bm, 896)

    # encoder: Linear(784,128) -> LeakyReLU -> Linear(128,32) -> LeakyReLU -> Linear(32,10)
    h = jnp.dot(x, w1[...], preferred_element_type=jnp.float32) + b1[...]
    h = _leaky_relu(h).astype(cd)                                         # (bm, 128)
    h = jnp.dot(h, w2[...], preferred_element_type=jnp.float32) + b2[...]
    h = _leaky_relu(h).astype(cd)                                         # (bm, 32)

    enc = jnp.dot(h, w3p[...], preferred_element_type=jnp.float32) + b3p[...]
    enc_ref[...] = enc.astype(enc_ref.dtype)                              # lane-dense (bm, 128)

    # decoder: [Linear(10,32) fused with the preceding Linear(32,10)] -> LeakyReLU
    #          -> Linear(32,128) -> LeakyReLU -> Linear(128,784) -> Tanh
    d = jnp.dot(h, w34[...], preferred_element_type=jnp.float32) + b34[...]
    d = _leaky_relu(d).astype(cd)                                         # (bm, 32)
    d = jnp.dot(d, w5[...], preferred_element_type=jnp.float32) + b5[...]
    d = _leaky_relu(d).astype(cd)                                         # (bm, 128)
    d = jnp.dot(d, w6p[...], preferred_element_type=jnp.float32) + b6p[...]
    dec_ref[...] = jnp.tanh(d).astype(dec_ref.dtype)                      # lane-dense (bm, 896)


def make_params(key):
    """Deterministic synthetic parameters; weights as (in, out), biases as (1, out)."""
    dims = [(IMAGE_SIZE, 128), (128, 32), (32, ENC_DIM),    # encoder
            (ENC_DIM, 32), (32, 128), (128, IMAGE_SIZE)]    # decoder
    params = []
    for (din, dout) in dims:
        key, kw, kb = jax.random.split(key, 3)
        bound = 1.0 / jnp.sqrt(din)  # mimics PyTorch Linear init scale
        w = jax.random.uniform(kw, (din, dout), jnp.float32, -bound, bound)
        b = jax.random.uniform(kb, (1, dout), jnp.float32, -bound, bound)
        params += [w, b]
    return params


def _prepare_kernel_params(params, compute_dtype):
    """Pad / fuse / cast the PyTorch-layout params into the kernel layout."""
    w1, b1, w2, b2, w3, b3, w4, b4, w5, b5, w6, b6 = params

    # Fuse Linear(32,10) -> Linear(10,32): no nonlinearity in between, so exact.
    w34 = w3 @ w4                       # (32, 32)
    b34 = b3 @ w4 + b4                  # (1, 32)

    # Zero-pad the lane dims so every matmul / output is lane-dense (multiples of 128).
    w1p = jnp.pad(w1, ((0, F_PAD - IMAGE_SIZE), (0, 0)))       # (896, 128); extra rows multiply zero x cols
    w3p = jnp.pad(w3, ((0, 0), (0, ENC_PAD - ENC_DIM)))        # (32, 128)
    b3p = jnp.pad(b3, ((0, 0), (0, ENC_PAD - ENC_DIM)))        # (1, 128)
    w6p = jnp.pad(w6, ((0, 0), (0, F_PAD - IMAGE_SIZE)))       # (128, 896)
    b6p = jnp.pad(b6, ((0, 0), (0, F_PAD - IMAGE_SIZE)))       # (1, 896)

    cd = compute_dtype
    # Weights in compute dtype (bf16 by default) for full-rate MXU; biases stay f32.
    return [w1p.astype(cd), b1, w2.astype(cd), b2, w3p.astype(cd), b3p,
            w34.astype(cd), b34, w5.astype(cd), b5, w6p.astype(cd), b6p]


@functools.partial(jax.jit, static_argnames=("block_m", "compute_dtype"))
def autoencoder_forward(x, params, *, block_m=None, compute_dtype=jnp.bfloat16):
    B, F = x.shape
    assert F == IMAGE_SIZE

    if block_m is None:
        # Big MXU-friendly tile; never larger than the (8-rounded) batch.
        block_m = min(256, _round_up(B, 8))
    Bp = _round_up(B, block_m)
    grid = (Bp // block_m,)

    kparams = _prepare_kernel_params(params, compute_dtype)

    # Zero-pad the batch and the feature dim (784 -> 896); padded rows/cols are sliced off below.
    xp = jnp.pad(x, ((0, Bp - B), (0, F_PAD - IMAGE_SIZE))).astype(compute_dtype)

    # Weights/biases are tiny (~0.9 MB total) -> full (un-tiled) blocks resident in VMEM.
    def full_spec(shape):
        return pl.BlockSpec(shape, lambda i: (0, 0))

    in_specs = ([pl.BlockSpec((block_m, F_PAD), lambda i: (i, 0))]
                + [full_spec(p.shape) for p in kparams])
    out_specs = [pl.BlockSpec((block_m, ENC_PAD), lambda i: (i, 0)),
                 pl.BlockSpec((block_m, F_PAD), lambda i: (i, 0))]
    out_shape = (jax.ShapeDtypeStruct((Bp, ENC_PAD), jnp.float32),
                 jax.ShapeDtypeStruct((Bp, F_PAD), jnp.float32))

    enc_p, dec_p = pl.pallas_call(
        autoencoder_kernel,
        out_shape=out_shape,
        grid_spec=pltpu.PrefetchScalarGridSpec(
            num_scalar_prefetch=0,
            grid=grid,
            in_specs=in_specs,
            out_specs=out_specs,
        ),
        compiler_params=pltpu.CompilerParams(
            dimension_semantics=("parallel",)),
    )(xp, *kparams)

    enc = enc_p[:B, :ENC_DIM].astype(x.dtype)
    dec = dec_p[:B, :IMAGE_SIZE].astype(x.dtype)
    return enc, dec


def reference_forward(x, params):
    """Pure-JAX reference with the original module's semantics (f32, unfused)."""
    w1, b1, w2, b2, w3, b3, w4, b4, w5, b5, w6, b6 = params
    lrelu = lambda v: jnp.where(v > 0, v, LEAKY_SLOPE * v)
    h = lrelu(x @ w1 + b1)
    h = lrelu(h @ w2 + b2)
    enc = h @ w3 + b3
    d = lrelu(enc @ w4 + b4)
    d = lrelu(d @ w5 + b5)
    dec = jnp.tanh(d @ w6 + b6)
    return enc, dec


if __name__ == "__main__":
    key = jax.random.PRNGKey(0)
    kx, kp = jax.random.split(key)

    B = 16  # small demo batch; the wrapper pads it up to the batch tile
    x = jax.random.normal(kx, (B, IMAGE_SIZE), jnp.float32)
    params = make_params(kp)

    enc_ref_v, dec_ref_v = reference_forward(x, params)

    # Default fast path: bf16 MXU inputs, f32 accumulation.
    enc_bf16, dec_bf16 = autoencoder_forward(x, params)
    enc_bf16 = jax.block_until_ready(enc_bf16)
    dec_bf16 = jax.block_until_ready(dec_bf16)
    assert enc_bf16.shape == (B, ENC_DIM) and dec_bf16.shape == (B, IMAGE_SIZE)
    assert jnp.allclose(enc_bf16, enc_ref_v, atol=5e-2, rtol=5e-2)
    assert jnp.allclose(dec_bf16, dec_ref_v, atol=5e-2, rtol=5e-2)

    # f32 path: tight numerical check of the kernel structure (padding + fusion).
    enc_f32, dec_f32 = autoencoder_forward(x, params, compute_dtype=jnp.float32)
    enc_f32 = jax.block_until_ready(enc_f32)
    dec_f32 = jax.block_until_ready(dec_f32)
    assert jnp.allclose(enc_f32, enc_ref_v, atol=1e-3, rtol=1e-3)
    assert jnp.allclose(dec_f32, dec_ref_v, atol=1e-3, rtol=1e-3)

    print("KERNEL_OK")
</pallas_src>

<mosaic_0001>
module attributes {stable_mosaic.version = 11 : i64} {
  func.func @autoencoder_kernel(%arg0: i32, %arg1: memref<16x896xbf16, #tpu.memory_space<vmem>>, %arg2: memref<896x128xbf16, #tpu.memory_space<vmem>>, %arg3: memref<1x128xf32, #tpu.memory_space<vmem>>, %arg4: memref<128x32xbf16, #tpu.memory_space<vmem>>, %arg5: memref<1x32xf32, #tpu.memory_space<vmem>>, %arg6: memref<32x128xbf16, #tpu.memory_space<vmem>>, %arg7: memref<1x128xf32, #tpu.memory_space<vmem>>, %arg8: memref<32x32xbf16, #tpu.memory_space<vmem>>, %arg9: memref<1x32xf32, #tpu.memory_space<vmem>>, %arg10: memref<32x128xbf16, #tpu.memory_space<vmem>>, %arg11: memref<1x128xf32, #tpu.memory_space<vmem>>, %arg12: memref<128x896xbf16, #tpu.memory_space<vmem>>, %arg13: memref<1x896xf32, #tpu.memory_space<vmem>>, %arg14: memref<16x128xf32, #tpu.memory_space<vmem>>, %arg15: memref<16x896xf32, #tpu.memory_space<vmem>>) attributes {dimension_semantics = [#tpu.dimension_semantics<parallel>], iteration_bounds = array<i64: 1>, scalar_prefetch = 0 : i64, scratch_operands = 0 : i64, tpu.core_type = #tpu.core_type<tc>, window_params = [{transform_indices = @transform_0, window_bounds = array<i64: 16, 896>}, {pipeline_mode = #tpu.pipeline_mode<synchronous>, transform_indices = @transform_1, window_bounds = array<i64: 896, 128>}, {pipeline_mode = #tpu.pipeline_mode<synchronous>, transform_indices = @transform_2, window_bounds = array<i64: 1, 128>}, {pipeline_mode = #tpu.pipeline_mode<synchronous>, transform_indices = @transform_3, window_bounds = array<i64: 128, 32>}, {pipeline_mode = #tpu.pipeline_mode<synchronous>, transform_indices = @transform_4, window_bounds = array<i64: 1, 32>}, {pipeline_mode = #tpu.pipeline_mode<synchronous>, transform_indices = @transform_5, window_bounds = array<i64: 32, 128>}, {pipeline_mode = #tpu.pipeline_mode<synchronous>, transform_indices = @transform_6, window_bounds = array<i64: 1, 128>}, {pipeline_mode = #tpu.pipeline_mode<synchronous>, transform_indices = @transform_7, window_bounds = array<i64: 32, 32>}, {pipeline_mode = #tpu.pipeline_mode<synchronous>, transform_indices = @transform_8, window_bounds = array<i64: 1, 32>}, {pipeline_mode = #tpu.pipeline_mode<synchronous>, transform_indices = @transform_9, window_bounds = array<i64: 32, 128>}, {pipeline_mode = #tpu.pipeline_mode<synchronous>, transform_indices = @transform_10, window_bounds = array<i64: 1, 128>}, {pipeline_mode = #tpu.pipeline_mode<synchronous>, transform_indices = @transform_11, window_bounds = array<i64: 128, 896>}, {pipeline_mode = #tpu.pipeline_mode<synchronous>, transform_indices = @transform_12, window_bounds = array<i64: 1, 896>}, {transform_indices = @transform_13, window_bounds = array<i64: 16, 128>}, {transform_indices = @transform_14, window_bounds = array<i64: 16, 896>}]} {
    %c0 = arith.constant 0 : index
    %c0_0 = arith.constant 0 : index
    %0 = vector.load %arg1[%c0, %c0_0] : memref<16x896xbf16, #tpu.memory_space<vmem>>, vector<16x896xbf16>
    %c0_1 = arith.constant 0 : index
    %c0_2 = arith.constant 0 : index
    %1 = vector.load %arg2[%c0_1, %c0_2] : memref<896x128xbf16, #tpu.memory_space<vmem>>, vector<896x128xbf16>
    %cst = arith.constant dense<0.000000e+00> : vector<16x128xf32>
    %2 = tpu.matmul %0, %1, %cst {dimension_numbers = #tpu.dot_dimension_numbers<[1], [0], [0], [1], [0, 0, 1, 1], [], []>} : vector<16x896xbf16>, vector<896x128xbf16>, vector<16x128xf32> -> vector<16x128xf32>
    %c0_3 = arith.constant 0 : index
    %c0_4 = arith.constant 0 : index
    %3 = vector.load %arg3[%c0_3, %c0_4] : memref<1x128xf32, #tpu.memory_space<vmem>>, vector<1x128xf32>
    %4 = vector.broadcast %3 : vector<1x128xf32> to vector<16x128xf32>
    %5 = arith.addf %2, %4 : vector<16x128xf32>
    %cst_5 = arith.constant 0.000000e+00 : f32
    %6 = vector.broadcast %cst_5 : f32 to vector<16x128xf32>
    %7 = arith.cmpf ogt, %5, %6 : vector<16x128xf32>
    %cst_6 = arith.constant 0.00999999977 : f32
    %8 = vector.broadcast %cst_6 : f32 to vector<16x128xf32>
    %9 = arith.mulf %8, %5 : vector<16x128xf32>
    %10 = arith.select %7, %5, %9 : vector<16x128xi1>, vector<16x128xf32>
    %11 = arith.truncf %10 : vector<16x128xf32> to vector<16x128xbf16>
    %c0_7 = arith.constant 0 : index
    %c0_8 = arith.constant 0 : index
    %12 = vector.load %arg4[%c0_7, %c0_8] : memref<128x32xbf16, #tpu.memory_space<vmem>>, vector<128x32xbf16>
    %cst_9 = arith.constant dense<0.000000e+00> : vector<16x32xf32>
    %13 = tpu.matmul %11, %12, %cst_9 {dimension_numbers = #tpu.dot_dimension_numbers<[1], [0], [0], [1], [0, 0, 1, 1], [], []>} : vector<16x128xbf16>, vector<128x32xbf16>, vector<16x32xf32> -> vector<16x32xf32>
    %c0_10 = arith.constant 0 : index
    %c0_11 = arith.constant 0 : index
    %14 = vector.load %arg5[%c0_10, %c0_11] : memref<1x32xf32, #tpu.memory_space<vmem>>, vector<1x32xf32>
    %15 = vector.broadcast %14 : vector<1x32xf32> to vector<16x32xf32>
    %16 = arith.addf %13, %15 : vector<16x32xf32>
    %cst_12 = arith.constant 0.000000e+00 : f32
    %17 = vector.broadcast %cst_12 : f32 to vector<16x32xf32>
    %18 = arith.cmpf ogt, %16, %17 : vector<16x32xf32>
    %cst_13 = arith.constant 0.00999999977 : f32
    %19 = vector.broadcast %cst_13 : f32 to vector<16x32xf32>
    %20 = arith.mulf %19, %16 : vector<16x32xf32>
    %21 = arith.select %18, %16, %20 : vector<16x32xi1>, vector<16x32xf32>
    %22 = arith.truncf %21 : vector<16x32xf32> to vector<16x32xbf16>
    %c0_14 = arith.constant 0 : index
    %c0_15 = arith.constant 0 : index
    %23 = vector.load %arg6[%c0_14, %c0_15] : memref<32x128xbf16, #tpu.memory_space<vmem>>, vector<32x128xbf16>
    %cst_16 = arith.constant dense<0.000000e+00> : vector<16x128xf32>
    %24 = tpu.matmul %22, %23, %cst_16 {dimension_numbers = #tpu.dot_dimension_numbers<[1], [0], [0], [1], [0, 0, 1, 1], [], []>} : vector<16x32xbf16>, vector<32x128xbf16>, vector<16x128xf32> -> vector<16x128xf32>
    %c0_17 = arith.constant 0 : index
    %c0_18 = arith.constant 0 : index
    %25 = vector.load %arg7[%c0_17, %c0_18] : memref<1x128xf32, #tpu.memory_space<vmem>>, vector<1x128xf32>
    %26 = vector.broadcast %25 : vector<1x128xf32> to vector<16x128xf32>
    %27 = arith.addf %24, %26 : vector<16x128xf32>
    %c0_19 = arith.constant 0 : index
    %c0_20 = arith.constant 0 : index
    %28 = vector.load %arg14[%c0_19, %c0_20] : memref<16x128xf32, #tpu.memory_space<vmem>>, vector<16x128xf32>
    tpu.vector_store %arg14[%c0_19, %c0_20], %27 {strides = array<i32>} : memref<16x128xf32, #tpu.memory_space<vmem>>, vector<16x128xf32>,
    %c0_21 = arith.constant 0 : index
    %c0_22 = arith.constant 0 : index
    %29 = vector.load %arg8[%c0_21, %c0_22] : memref<32x32xbf16, #tpu.memory_space<vmem>>, vector<32x32xbf16>
    %cst_23 = arith.constant dense<0.000000e+00> : vector<16x32xf32>
    %30 = tpu.matmul %22, %29, %cst_23 {dimension_numbers = #tpu.dot_dimension_numbers<[1], [0], [0], [1], [0, 0, 1, 1], [], []>} : vector<16x32xbf16>, vector<32x32xbf16>, vector<16x32xf32> -> vector<16x32xf32>
    %c0_24 = arith.constant 0 : index
    %c0_25 = arith.constant 0 : index
    %31 = vector.load %arg9[%c0_24, %c0_25] : memref<1x32xf32, #tpu.memory_space<vmem>>, vector<1x32xf32>
    %32 = vector.broadcast %31 : vector<1x32xf32> to vector<16x32xf32>
    %33 = arith.addf %30, %32 : vector<16x32xf32>
    %cst_26 = arith.constant 0.000000e+00 : f32
    %34 = vector.broadcast %cst_26 : f32 to vector<16x32xf32>
    %35 = arith.cmpf ogt, %33, %34 : vector<16x32xf32>
    %cst_27 = arith.constant 0.00999999977 : f32
    %36 = vector.broadcast %cst_27 : f32 to vector<16x32xf32>
    %37 = arith.mulf %36, %33 : vector<16x32xf32>
    %38 = arith.select %35, %33, %37 : vector<16x32xi1>, vector<16x32xf32>
    %39 = arith.truncf %38 : vector<16x32xf32> to vector<16x32xbf16>
    %c0_28 = arith.constant 0 : index
    %c0_29 = arith.constant 0 : index
    %40 = vector.load %arg10[%c0_28, %c0_29] : memref<32x128xbf16, #tpu.memory_space<vmem>>, vector<32x128xbf16>
    %cst_30 = arith.constant dense<0.000000e+00> : vector<16x128xf32>
    %41 = tpu.matmul %39, %40, %cst_30 {dimension_numbers = #tpu.dot_dimension_numbers<[1], [0], [0], [1], [0, 0, 1, 1], [], []>} : vector<16x32xbf16>, vector<32x128xbf16>, vector<16x128xf32> -> vector<16x128xf32>
    %c0_31 = arith.constant 0 : index
    %c0_32 = arith.constant 0 : index
    %42 = vector.load %arg11[%c0_31, %c0_32] : memref<1x128xf32, #tpu.memory_space<vmem>>, vector<1x128xf32>
    %43 = vector.broadcast %42 : vector<1x128xf32> to vector<16x128xf32>
    %44 = arith.addf %41, %43 : vector<16x128xf32>
    %cst_33 = arith.constant 0.000000e+00 : f32
    %45 = vector.broadcast %cst_33 : f32 to vector<16x128xf32>
    %46 = arith.cmpf ogt, %44, %45 : vector<16x128xf32>
    %cst_34 = arith.constant 0.00999999977 : f32
    %47 = vector.broadcast %cst_34 : f32 to vector<16x128xf32>
    %48 = arith.mulf %47, %44 : vector<16x128xf32>
    %49 = arith.select %46, %44, %48 : vector<16x128xi1>, vector<16x128xf32>
    %50 = arith.truncf %49 : vector<16x128xf32> to vector<16x128xbf16>
    %c0_35 = arith.constant 0 : index
    %c0_36 = arith.constant 0 : index
    %51 = vector.load %arg12[%c0_35, %c0_36] : memref<128x896xbf16, #tpu.memory_space<vmem>>, vector<128x896xbf16>
    %cst_37 = arith.constant dense<0.000000e+00> : vector<16x896xf32>
    %52 = tpu.matmul %50, %51, %cst_37 {dimension_numbers = #tpu.dot_dimension_numbers<[1], [0], [0], [1], [0, 0, 1, 1], [], []>} : vector<16x128xbf16>, vector<128x896xbf16>, vector<16x896xf32> -> vector<16x896xf32>
    %c0_38 = arith.constant 0 : index
    %c0_39 = arith.constant 0 : index
    %53 = vector.load %arg13[%c0_38, %c0_39] : memref<1x896xf32, #tpu.memory_space<vmem>>, vector<1x896xf32>
    %54 = vector.broadcast %53 : vector<1x896xf32> to vector<16x896xf32>
    %55 = arith.addf %52, %54 : vector<16x896xf32>
    %56 = math.tanh %55 : vector<16x896xf32>
    %c0_40 = arith.constant 0 : index
    %c0_41 = arith.constant 0 : index
    %57 = vector.load %arg15[%c0_40, %c0_41] : memref<16x896xf32, #tpu.memory_space<vmem>>, vector<16x896xf32>
    tpu.vector_store %arg15[%c0_40, %c0_41], %56 {strides = array<i32>} : memref<16x896xf32, #tpu.memory_space<vmem>>, vector<16x896xf32>,
    return
  }
  func.func @transform_0(%arg0: i32) -> (i32, i32) {
    %c0_i32 = arith.constant 0 : i32
    %c0_i32_0 = arith.constant 0 : i32
    return %arg0, %c0_i32 : i32, i32
  }
  func.func @transform_1(%arg0: i32) -> (i32, i32) {
    %c0_i32 = arith.constant 0 : i32
    %c0_i32_0 = arith.constant 0 : i32
    %c0_i32_1 = arith.constant 0 : i32
    return %c0_i32, %c0_i32_0 : i32, i32
  }
  func.func @transform_2(%arg0: i32) -> (i32, i32) {
    %c0_i32 = arith.constant 0 : i32
    %c0_i32_0 = arith.constant 0 : i32
    %c0_i32_1 = arith.constant 0 : i32
    return %c0_i32, %c0_i32_0 : i32, i32
  }
  func.func @transform_3(%arg0: i32) -> (i32, i32) {
    %c0_i32 = arith.constant 0 : i32
    %c0_i32_0 = arith.constant 0 : i32
    %c0_i32_1 = arith.constant 0 : i32
    return %c0_i32, %c0_i32_0 : i32, i32
  }
  func.func @transform_4(%arg0: i32) -> (i32, i32) {
    %c0_i32 = arith.constant 0 : i32
    %c0_i32_0 = arith.constant 0 : i32
    %c0_i32_1 = arith.constant 0 : i32
    return %c0_i32, %c0_i32_0 : i32, i32
  }
  func.func @transform_5(%arg0: i32) -> (i32, i32) {
    %c0_i32 = arith.constant 0 : i32
    %c0_i32_0 = arith.constant 0 : i32
    %c0_i32_1 = arith.constant 0 : i32
    return %c0_i32, %c0_i32_0 : i32, i32
  }
  func.func @transform_6(%arg0: i32) -> (i32, i32) {
    %c0_i32 = arith.constant 0 : i32
    %c0_i32_0 = arith.constant 0 : i32
    %c0_i32_1 = arith.constant 0 : i32
    return %c0_i32, %c0_i32_0 : i32, i32
  }
  func.func @transform_7(%arg0: i32) -> (i32, i32) {
    %c0_i32 = arith.constant 0 : i32
    %c0_i32_0 = arith.constant 0 : i32
    %c0_i32_1 = arith.constant 0 : i32
    return %c0_i32, %c0_i32_0 : i32, i32
  }
  func.func @transform_8(%arg0: i32) -> (i32, i32) {
    %c0_i32 = arith.constant 0 : i32
    %c0_i32_0 = arith.constant 0 : i32
    %c0_i32_1 = arith.constant 0 : i32
    return %c0_i32, %c0_i32_0 : i32, i32
  }
  func.func @transform_9(%arg0: i32) -> (i32, i32) {
    %c0_i32 = arith.constant 0 : i32
    %c0_i32_0 = arith.constant 0 : i32
    %c0_i32_1 = arith.constant 0 : i32
    return %c0_i32, %c0_i32_0 : i32, i32
  }
  func.func @transform_10(%arg0: i32) -> (i32, i32) {
    %c0_i32 = arith.constant 0 : i32
    %c0_i32_0 = arith.constant 0 : i32
    %c0_i32_1 = arith.constant 0 : i32
    return %c0_i32, %c0_i32_0 : i32, i32
  }
  func.func @transform_11(%arg0: i32) -> (i32, i32) {
    %c0_i32 = arith.constant 0 : i32
    %c0_i32_0 = arith.constant 0 : i32
    %c0_i32_1 = arith.constant 0 : i32
    return %c0_i32, %c0_i32_0 : i32, i32
  }
  func.func @transform_12(%arg0: i32) -> (i32, i32) {
    %c0_i32 = arith.constant 0 : i32
    %c0_i32_0 = arith.constant 0 : i32
    %c0_i32_1 = arith.constant 0 : i32
    return %c0_i32, %c0_i32_0 : i32, i32
  }
  func.func @transform_13(%arg0: i32) -> (i32, i32) {
    %c0_i32 = arith.constant 0 : i32
    %c0_i32_0 = arith.constant 0 : i32
    return %arg0, %c0_i32 : i32, i32
  }
  func.func @transform_14(%arg0: i32) -> (i32, i32) {
    %c0_i32 = arith.constant 0 : i32
    %c0_i32_0 = arith.constant 0 : i32
    return %arg0, %c0_i32 : i32, i32
  }
}

</mosaic_0001>

<bundles_post_ra>
// kernel: autoencoder_forward.1
= control target key start
LH: loop header
LB: loop body
LE: loop exit
PB: predicated region body
PF: predicated region fallthrough
CT: control target
= control target key end

     0   :  { %20 = vsyncpa [#allocation3], 0  ;;  %v2244_v38 = vmov 0.0   ;;  %vm2245_vm0 = vmmov 0   ;;  %s2814_s0 = inlined_call_operand.vmem [shape: bf16[16,896], index: 0, kind: input, shape index: {}]   ;;  %s2815_s1 = inlined_call_operand.vmem [shape: bf16[896,128], index: 1, kind: input, shape index: {}]   ;;  %s2816_s2 = inlined_call_operand.vmem [shape: f32[1,128], index: 2, kind: input, shape index: {}]   ;;  %s2817_s3 = inlined_call_operand.vmem [shape: bf16[128,32], index: 3, kind: input, shape index: {}]   ;;  %s2818_s4 = inlined_call_operand.vmem [shape: f32[1,32], index: 4, kind: input, shape index: {}]   ;;  %s2819_s5 = inlined_call_operand.vmem [shape: bf16[32,128], index: 5, kind: input, shape index: {}]   ;;  %s2820_s6 = inlined_call_operand.vmem [shape: f32[1,128], index: 6, kind: input, shape index: {}]   ;;  %s2821_s7 = inlined_call_operand.vmem [shape: bf16[32,32], index: 7, kind: input, shape index: {}]   ;;  %s2822_s8 = inlined_call_operand.vmem [shape: f32[1,32], index: 8, kind: input, shape index: {}]   ;;  %s2823_s9 = inlined_call_operand.vmem [shape: bf16[32,128], index: 9, kind: input, shape index: {}]   ;;  %s2824_s10 = inlined_call_operand.vmem [shape: f32[1,128], index: 10, kind: input, shape index: {}]   ;;  %s2825_s11 = inlined_call_operand.vmem [shape: bf16[128,896], index: 11, kind: input, shape index: {}]   ;;  %s2826_s12 = inlined_call_operand.vmem [shape: f32[1,896], index: 12, kind: input, shape index: {}]   ;;  %s2827_s13 = inlined_call_operand.hbm [shape: f32[16,128], index: 13, kind: output, shape index: {0}]   ;;  %s2828_s14 = inlined_call_operand.hbm [shape: f32[16,896], index: 14, kind: output, shape index: {1}]  }
   0x1   :  { %v2008_v0 = vld [vmem:[%s2815_s1 + $0x40] sm:$0xff]   ;;  %v2012_v4 = vld [vmem:[%s2815_s1 + $0x48] sm:$0xff]   ;;  %v2016_v8 = vld [vmem:[%s2815_s1 + $0x50] sm:$0xff]  }
   0x2   :  { %v2009_v1 = vld [vmem:[%s2815_s1] sm:$0xff]   ;;  %1813 = vmatprep.subr.bf16.mxu0 %v2008_v0  ;;  %v2013_v5 = vld [vmem:[%s2815_s1 + $0x8] sm:$0xff]   ;;  %v2017_v9 = vld [vmem:[%s2815_s1 + $0x10] sm:$0xff]  }
   0x3   :  { %v2010_v2 = vld [vmem:[%s2815_s1 + $0xc0] sm:$0xff]   ;;  %1814 = vmatpush3.bf16.msra.mxu0 %v2009_v1  ;;  %v2014_v6 = vld [vmem:[%s2815_s1 + $0xc8] sm:$0xff]   ;;  %v2018_v10 = vld [vmem:[%s2815_s1 + $0xd0] sm:$0xff]  }
   0x4   :  { %v2011_v3 = vld [vmem:[%s2815_s1 + $0x80] sm:$0xff]   ;;  %1835 = vmatprep.subr.bf16.mxu1 %v2010_v2  ;;  %1815 = vmatprep.subr.bf16.mxu0 %v2012_v4  ;;  %v2015_v7 = vld [vmem:[%s2815_s1 + $0x88] sm:$0xff]   ;;  %v2019_v11 = vld [vmem:[%s2815_s1 + $0x90] sm:$0xff]  }
   0x5   :  { %1836 = vmatpush3.bf16.msra.mxu1 %v2011_v3  ;;  %v2020_v12 = vld [vmem:[%s2815_s1 + $0x58] sm:$0xff]   ;;  %v2024_v16 = vld [vmem:[%s2815_s1 + $0x60] sm:$0xff]   ;;  %v2028_v20 = vld [vmem:[%s2815_s1 + $0x68] sm:$0xff]  }
   0x6   :  { %1837 = vmatprep.subr.bf16.mxu1 %v2014_v6  ;;  %v2021_v13 = vld [vmem:[%s2815_s1 + $0x18] sm:$0xff]   ;;  %v2025_v17 = vld [vmem:[%s2815_s1 + $0x20] sm:$0xff]   ;;  %v2029_v21 = vld [vmem:[%s2815_s1 + $0x28] sm:$0xff]  }
   0x7   :  { %1816 = vmatpush3.bf16.msra.mxu0 %v2013_v5  ;;  %v2022_v14 = vld [vmem:[%s2815_s1 + $0xd8] sm:$0xff]   ;;  %v2026_v18 = vld [vmem:[%s2815_s1 + $0xe0] sm:$0xff]   ;;  %v2030_v22 = vld [vmem:[%s2815_s1 + $0xe8] sm:$0xff]  }
   0x8   :  { %1817 = vmatprep.subr.bf16.mxu0 %v2016_v8  ;;  %v2023_v15 = vld [vmem:[%s2815_s1 + $0x98] sm:$0xff]   ;;  %v2027_v19 = vld [vmem:[%s2815_s1 + $0xa0] sm:$0xff]   ;;  %v2031_v23 = vld [vmem:[%s2815_s1 + $0xa8] sm:$0xff]  }
   0x9   :  { %1838 = vmatpush3.bf16.msra.mxu1 %v2015_v7  ;;  %v2032_v24 = vld [vmem:[%s2815_s1 + $0x70] sm:$0xff]   ;;  %v2036_v28 = vld [vmem:[%s2815_s1 + $0x78] sm:$0xff]   ;;  %v2041_v32 = vld [vmem:[%s2814_s0 + $0x4] ss:$28 sps:$4 sm:$0xff]  }
   0xa   :  { %1839 = vmatprep.subr.bf16.mxu1 %v2018_v10  ;;  %v2033_v25 = vld [vmem:[%s2815_s1 + $0x30] sm:$0xff]   ;;  %v2037_v29 = vld [vmem:[%s2815_s1 + $0x38] sm:$0xff]   ;;  %580 = vmatprep.mubr.bf16.mxu0 %v2041_v32  ;;  %v2043_v34 = vld [vmem:[%s2815_s1 + $0x140] sm:$0xff]  }
   0xb   :  { %1818 = vmatpush3.bf16.msra.mxu0 %v2017_v9  ;;  %v2034_v26 = vld [vmem:[%s2815_s1 + $0xf0] sm:$0xff]   ;;  %v2038_v30 = vld [vmem:[%s2815_s1 + $0xf8] sm:$0xff]   ;;  %v2044_v35 = vld [vmem:[%s2814_s0 + $0x8] ss:$28 sps:$4 sm:$0xff]  }
   0xc   :  { %1819 = vmatprep.subr.bf16.mxu0 %v2020_v12  ;;  %v2035_v27 = vld [vmem:[%s2815_s1 + $0xb0] sm:$0xff]   ;;  %v2039_v31 = vld [vmem:[%s2814_s0] ss:$28 sps:$4 sm:$0xff]   ;;  %v2046_v36 = vld [vmem:[%s2814_s0 + $0xc] ss:$28 sps:$4 sm:$0xff]  }
   0xd   :  { %1840 = vmatpush3.bf16.msra.mxu1 %v2019_v11  ;;  %v2042_v33 = vld [vmem:[%s2815_s1 + $0xb8] sm:$0xff]   ;;  %v2047_v37 = vld [vmem:[%s2815_s1 + $0x100] sm:$0xff]   ;;  %621 = vmatprep.mubr.bf16.mxu1 %v2046_v36  ;;  %v2049_v40 = vld [vmem:[%s2815_s1 + $0x148] sm:$0xff]  }
   0xe   :  { %1841 = vmatprep.subr.bf16.mxu1 %v2022_v14  ;;  %v2048_v39 = vld [vmem:[%s2815_s1 + $0x180] sm:$0xff]   ;;  %v2050_v41 = vld [vmem:[%s2815_s1 + $0x108] sm:$0xff]   ;;  %v2052_v43 = vld [vmem:[%s2815_s1 + $0x150] sm:$0xff]  }
   0xf   :  { %1820 = vmatpush3.bf16.msra.mxu0 %v2021_v13  ;;  %v2051_v42 = vld [vmem:[%s2815_s1 + $0x188] sm:$0xff]   ;;  %v2053_v44 = vld [vmem:[%s2815_s1 + $0x110] sm:$0xff]   ;;  %v2055_v46 = vld [vmem:[%s2815_s1 + $0x158] sm:$0xff]  }
  0x10   :  { %1821 = vmatprep.subr.bf16.mxu0 %v2024_v16  ;;  %v2054_v45 = vld [vmem:[%s2815_s1 + $0x190] sm:$0xff]   ;;  %v2056_v47 = vld [vmem:[%s2815_s1 + $0x118] sm:$0xff]   ;;  %v2058_v49 = vld [vmem:[%s2815_s1 + $0x160] sm:$0xff]  }
  0x11   :  { %1842 = vmatpush3.bf16.msra.mxu1 %v2023_v15  ;;  %v2057_v48 = vld [vmem:[%s2815_s1 + $0x198] sm:$0xff]   ;;  %v2059_v50 = vld [vmem:[%s2815_s1 + $0x120] sm:$0xff]   ;;  %v2061_v52 = vld [vmem:[%s2815_s1 + $0x168] sm:$0xff]  }
  0x12   :  { %1843 = vmatprep.subr.bf16.mxu1 %v2026_v18  ;;  %v2060_v51 = vld [vmem:[%s2815_s1 + $0x1a0] sm:$0xff]   ;;  %v2062_v53 = vld [vmem:[%s2815_s1 + $0x128] sm:$0xff]   ;;  %v2064_v55 = vld [vmem:[%s2815_s1 + $0x170] sm:$0xff]  }
  0x13   :  { %1822 = vmatpush3.bf16.msra.mxu0 %v2025_v17  ;;  %v2063_v54 = vld [vmem:[%s2815_s1 + $0x1a8] sm:$0xff]   ;;  %v2065_v56 = vld [vmem:[%s2815_s1 + $0x130] sm:$0xff]   ;;  %v2067_v59 = vld [vmem:[%s2815_s1 + $0x178] sm:$0xff]  }
  0x14   :  { %1823 = vmatprep.subr.bf16.mxu0 %v2028_v20  ;;  %v2066_v57 = vld [vmem:[%s2815_s1 + $0x1b0] sm:$0xff]   ;;  %v2068_v60 = vld [vmem:[%s2815_s1 + $0x138] sm:$0xff]  }
  0x15   :  { %1844 = vmatpush3.bf16.msra.mxu1 %v2027_v19  ;;  %v2071_v58 = vld [vmem:[%s2814_s0 + $0x14] ss:$28 sps:$4 sm:$0xff]   ;;  %v2072_v61 = vld [vmem:[%s2815_s1 + $0x1b8] sm:$0xff]  }
  0x16   :  { %1845 = vmatprep.subr.bf16.mxu1 %v2030_v22  ;;  %v2069_v62 = vld [vmem:[%s2814_s0 + $0x10] ss:$28 sps:$4 sm:$0xff]   ;;  %v2073_v63 = vld [vmem:[%s2814_s0 + $0x18] ss:$28 sps:$4 sm:$0xff]  }
  0x17   :  { %1824 = vmatpush3.bf16.msra.mxu0 %v2029_v21 }
  0x18   :  { %1825 = vmatprep.subr.bf16.mxu0 %v2032_v24 }
  0x19   :  { %1846 = vmatpush3.bf16.msra.mxu1 %v2031_v23 }
  0x1a   :  { %1847 = vmatprep.subr.bf16.mxu1 %v2034_v26 }
  0x1b   :  { %1826 = vmatpush3.bf16.msra.mxu0 %v2033_v25 }
  0x1c   :  { %1827 = vmatprep.subr.bf16.mxu0 %v2036_v28 }
  0x1d   :  { %1848 = vmatpush3.bf16.msra.mxu1 %v2035_v27 }
  0x1e   :  { %1849 = vmatprep.subr.bf16.mxu1 %v2038_v30 }
  0x1f   :  { %1828 = vmatpush3.bf16.msra.mxu0 %v2037_v29 }
  0x20   :  { %1857 = vmatprep.subr.bf16.mxu0 %v2043_v34 }
  0x21   :  { %1850 = vmatpush3.bf16.msra.mxu1 %v2042_v33 }
  0x22   :  { %581 = vmatmul.mubr.bf16.vlgmr.msra.gmra.mrb[0].mxu0 %v2039_v31  ;;  %1915 = vmatprep.subr.bf16.mxu1 %v2244_v38 }
  0x23   :  { %1858 = vmatpush3.bf16.msra.mxu0 %v2047_v37  ;;  %662 = vmatprep.mubr.bf16.mxu0 %v2071_v58 }
  0x24   :  { %622 = vmatmul.mubr.bf16.vlgmr.msra.gmra.mrb[0].mxu1 %v2044_v35  ;;  %1859 = vmatprep.subr.bf16.mxu0 %v2049_v40 }
  0x25   :  { %1916 = vmatpush3.bf16.msra.mxu1 %v2048_v39  ;;  %1931 = vmatprep.mubr.msk.bf16.mxu1 %vm2245_vm0, %v2244_v38 }
  0x26   :  { %1917 = vmatprep.subr.bf16.mxu1 %v2244_v38 }
  0x27   :  { %1860 = vmatpush3.bf16.msra.mxu0 %v2050_v41 }
  0x28   :  { %1861 = vmatprep.subr.bf16.mxu0 %v2052_v43 }
  0x29   :  { %1918 = vmatpush3.bf16.msra.mxu1 %v2051_v42 }
  0x2a   :  { %1919 = vmatprep.subr.bf16.mxu1 %v2244_v38 }
  0x2b   :  { %1862 = vmatpush3.bf16.msra.mxu0 %v2053_v44 }
  0x2c   :  { %1863 = vmatprep.subr.bf16.mxu0 %v2055_v46 }
  0x2d   :  { %1920 = vmatpush3.bf16.msra.mxu1 %v2054_v45 }
  0x2e   :  { %1921 = vmatprep.subr.bf16.mxu1 %v2244_v38 }
  0x2f   :  { %1864 = vmatpush3.bf16.msra.mxu0 %v2056_v47 }
  0x30   :  { %1865 = vmatprep.subr.bf16.mxu0 %v2058_v49 }
  0x31   :  { %1922 = vmatpush3.bf16.msra.mxu1 %v2057_v48 }
  0x32   :  { %1923 = vmatprep.subr.bf16.mxu1 %v2244_v38 }
  0x33   :  { %1866 = vmatpush3.bf16.msra.mxu0 %v2059_v50 }
  0x34   :  { %1867 = vmatprep.subr.bf16.mxu0 %v2061_v52 }
  0x35   :  { %1924 = vmatpush3.bf16.msra.mxu1 %v2060_v51 }
  0x36   :  { %1925 = vmatprep.subr.bf16.mxu1 %v2244_v38 }
  0x37   :  { %1868 = vmatpush3.bf16.msra.mxu0 %v2062_v53 }
  0x38   :  { %1869 = vmatprep.subr.bf16.mxu0 %v2064_v55 }
  0x39   :  { %1926 = vmatpush3.bf16.msra.mxu1 %v2063_v54 }
  0x3a   :  { %1927 = vmatprep.subr.bf16.mxu1 %v2244_v38 }
  0x3b   :  { %1870 = vmatpush3.bf16.msra.mxu0 %v2065_v56 }
  0x3c   :  { %1871 = vmatprep.subr.bf16.mxu0 %v2067_v59 }
  0x3d   :  { %1928 = vmatpush3.bf16.msra.mxu1 %v2066_v57 }
  0x3e   :  { %1929 = vmatprep.subr.bf16.mxu1 %v2244_v38 }
  0x3f   :  { %1872 = vmatpush3.bf16.msra.mxu0 %v2068_v60 }
  0x40   :  { %1935 = vmatprep.subr.bf16.mxu0 %v2244_v38 }
  0x41   :  { %1930 = vmatpush3.bf16.msra.mxu1 %v2072_v61 }
  0x42   :  { %1955 = vmatprep.subr.bf16.mxu1 %v2244_v38  ;;  %663 = vmatmul.mubr.bf16.vlgmr.msra.gmra.mrb[4].mxu0 %v2069_v62 }
  0x43   :  { %1951 = vmatprep.mubr.msk.bf16.mxu0 %vm2245_vm0, %v2244_v38 }
  0x44   :  { %1932 = vmatmul.mubr.bf16.vlgmr.msra.gmra.mrb[4].mxu1 %v2073_v63 }
  0x45   :  { %1959 = vmatprep.mubr.msk.bf16.mxu1 %vm2245_vm0, %v2244_v38 }
  0x46   :  { %21 = vsyncpa [#allocation5], 0  ;;  %v2074_v0 = vld [vmem:[%s2817_s3] sm:$0xff]   ;;  %v2075_v1 = vld [vmem:[%s2817_s3 + $0x8] sm:$0xff]   ;;  %vm861_vm5 = vcmask 261120   ;;  %s2247_s1 = smov [#allocation2]  }
  0x47   :  { %1936 = vmatpush3.bf16.msra.mxu0 %v2074_v0  ;;  %v2076_v2 = vld [vmem:[%s2817_s3 + $0x10] sm:$0xff]   ;;  %v2077_v3 = vld [vmem:[%s2817_s3 + $0x18] sm:$0xff]   ;;  %v2078_v4 = vld [vmem:[%s2817_s3 + $0x20] sm:$0xff]   ;;  %s1645_s27 = sshll.u32 %s2247_s1, 4  ;;  %s1646_s27 = int_to_ptr.vmem [resolvable:$true] %s1645_s27 }
  0x48   :  { %1937 = vmatprep.subr.bf16.mxu0 %v2244_v38  ;;  %v2079_v5 = vld [vmem:[%s2817_s3 + $0x28] sm:$0xff]   ;;  %v2080_v6 = vld [vmem:[%s2817_s3 + $0x30] sm:$0xff]   ;;  %v2081_v7 = vld [vmem:[%s2817_s3 + $0x38] sm:$0xff]   ;;  %s2196_s0 = scalar_lea.vmem %s1646_s27, 256  ;;  %p2201_p1 = scmp.lt.s32.totalorder %s1646_s27, %s1646_s27 }
  0x49   :  { %v1672_v9 = vld [vmem:[%s2816_s2] ss:$0 sm:$0xff]  ;;  %v2083_v46 = vld [vmem:[%s2819_s5 + $0x8] sm:$0xff]   ;;  %p2197_p0 = scmp.ne.s32.totalorder %s1646_s27, %s2196_s0  ;;  %p2202_p2 = scmp.lt.s32.totalorder %s2196_s0, %s2196_s0 }
  0x4a   :  { %v2082_v45 = vld [vmem:[%s2819_s5] sm:$0xff]   ;;  %v2085_v60 = vld [vmem:[%s2821_s7 + $0x8] sm:$0xff]  }
  0x4b   :  { %1938 = vmatpush3.bf16.msra.mxu0 %v2075_v1  ;;  %1956 = vmatpush3.bf16.msra.mxu1 %v2082_v45  ;;  %v1736_v47 = vld [vmem:[%s2818_s4] ss:$0 sm:$0xff]  ;;  %v2087_v62 = vld [vmem:[%s2823_s9 + $0x8] sm:$0xff]   ;;  %p2203_p3 = por %p2202_p2, %p2201_p1 }
  0x4c   :  { %1939 = vmatprep.subr.bf16.mxu0 %v2244_v38  ;;  %1957 = vmatprep.subr.bf16.mxu1 %v2244_v38  ;;  %v2084_v58 = vld [vmem:[%s2821_s7] sm:$0xff]   ;;  %v2093_v1 = vld [vmem:[%s2825_s11 + $0xc] ss:$28 sps:$4 sm:$0xff]  }
  0x4d   :  { %v2086_v61 = vld [vmem:[%s2823_s9] sm:$0xff]   ;;  %v2124_v45 = vld [vmem:[%s2825_s11 + $0x150] ss:$28 sps:$4 sm:$0xff]   ;;  %p2204_p4 = pnand %p2203_p3, %p2197_p0 }
  0x4e   :  { %v2090_v63 = vld [vmem:[%s2825_s11 + $0x4] ss:$28 sps:$4 sm:$0xff]  }
  0x4f   :  { %1940 = vmatpush3.bf16.msra.mxu0 %v2076_v2  ;;  %1958 = vmatpush3.bf16.msra.mxu1 %v2083_v46  ;;  %v2091_v0 = vld [vmem:[%s2825_s11 + $0x8] ss:$28 sps:$4 sm:$0xff]   ;;  %v2127_v46 = vld [vmem:[%s2825_s11 + $0x158] ss:$28 sps:$4 sm:$0xff]  }
  0x50   :  { %1941 = vmatprep.subr.bf16.mxu0 %v2244_v38  ;;  %1963 = vmatprep.subr.bf16.mxu1 %v2244_v38  ;;  %v2099_v2 = vld [vmem:[%s2825_s11 + $0x44] ss:$28 sps:$4 sm:$0xff]  }
  0x53   :  { %1942 = vmatpush3.bf16.msra.mxu0 %v2077_v3  ;;  %v2097_v3 = vld [vmem:[%s2825_s11 + $0x40] ss:$28 sps:$4 sm:$0xff]  }
  0x54   :  { %1943 = vmatprep.subr.bf16.mxu0 %v2244_v38 }
  0x57   :  { %1944 = vmatpush3.bf16.msra.mxu0 %v2078_v4  ;;  %v2105_v4 = vld [vmem:[%s2825_s11 + $0x7c] ss:$28 sps:$4 sm:$0xff]  }
  0x58   :  { %1945 = vmatprep.subr.bf16.mxu0 %v2244_v38 }
  0x5b   :  { %1946 = vmatpush3.bf16.msra.mxu0 %v2079_v5  ;;  %v2103_v5 = vld [vmem:[%s2825_s11 + $0x78] ss:$28 sps:$4 sm:$0xff]  }
  0x5c   :  { %1947 = vmatprep.subr.bf16.mxu0 %v2244_v38 }
  0x5f   :  { %1948 = vmatpush3.bf16.msra.mxu0 %v2080_v6  ;;  %v2111_v6 = vld [vmem:[%s2825_s11 + $0xb4] ss:$28 sps:$4 sm:$0xff]  }
  0x60   :  { %1949 = vmatprep.subr.bf16.mxu0 %v2244_v38 }
  0x63   :  { %1950 = vmatpush3.bf16.msra.mxu0 %v2081_v7  ;;  %v2109_v7 = vld [vmem:[%s2825_s11 + $0xb0] ss:$28 sps:$4 sm:$0xff]  }
  0x64   :  { %1485 = vmatprep.subr.bf16.mxu0 %v2093_v1  ;;  %v2139_v1 = vld [vmem:[%s2825_s11 + $0x18] ss:$28 sps:$4 sm:$0xff]  }
  0xf5   :  { %v1829_v8 = vpop.f32.mrb[0].mxu0 }
  0xf6   :  { %v1830_v10 = vpop.f32.mrb[1].mxu0 }
  0xf7   :  { %v1831_v11 = vadd.f32 %v1830_v10, %v1829_v8  ;;  %v1832_v12 = vpop.f32.mrb[2].mxu0  ;;  %v1851_v13 = vpop.f32.mrb[0].mxu1  ;;  %v2117_v8 = vld [vmem:[%s2825_s11 + $0xec] ss:$28 sps:$4 sm:$0xff]   ;;  %v2123_v10 = vld [vmem:[%s2825_s11 + $0x124] ss:$28 sps:$4 sm:$0xff]  }
  0xf8   :  { %v1833_v14 = vpop.f32.mrb[3].mxu0  ;;  %v1852_v17 = vpop.f32.mrb[1].mxu1 }
  0xf9   :  { %v583_v15 = vadd.f32 %v1831_v11, %v1672_v9  ;;  %v1834_v16 = vadd.f32 %v1833_v14, %v1832_v12  ;;  %v1853_v18 = vadd.f32 %v1852_v17, %v1851_v13  ;;  %v1854_v19 = vpop.f32.mrb[2].mxu1  ;;  %v2121_v11 = vld [vmem:[%s2825_s11 + $0x120] ss:$28 sps:$4 sm:$0xff]  }
  0xfa   :  { %v1855_v21 = vpop.f32.mrb[3].mxu1  ;;  %v1745_v12 = vld [vmem:[%s2820_s6] ss:$0 sm:$0xff] }
  0xfb   :  { %v586_v20 = vadd.f32 %v1834_v16, %v1672_v9  ;;  %v624_v22 = vadd.f32 %v1853_v18, %v583_v15  ;;  %v1856_v23 = vadd.f32 %v1855_v21, %v1854_v19  ;;  %v2115_v9 = vld [vmem:[%s2825_s11 + $0xe8] ss:$28 sps:$4 sm:$0xff]   ;;  %v1749_v19 = vld [vmem:[%s2822_s8] ss:$0 sm:$0xff] }
  0xfd   :  { %v627_v24 = vadd.f32 %v1856_v23, %v586_v20 }
 0x115   :  { %v1873_v25 = vpop.f32.mrb[4].mxu0 }
 0x116   :  { %v1874_v26 = vpop.f32.mrb[5].mxu0 }
 0x117   :  { %v705_v27 = vpop.f32.mrb[4].mxu1  ;;  %v1875_v28 = vadd.f32 %v1874_v26, %v1873_v25  ;;  %v1876_v29 = vpop.f32.mrb[6].mxu0 }
 0x118   :  { %v1933_v30 = vpop.f32.mrb[5].mxu1  ;;  %v1877_v31 = vpop.f32.mrb[7].mxu0 }
 0x119   :  { %v708_v32 = vpop.f32.mrb[6].mxu1  ;;  %v665_v33 = vadd.f32 %v1875_v28, %v624_v22  ;;  %v1878_v34 = vadd.f32 %v1877_v31, %v1876_v29  ;;  %v2088_v30 = vld [vmem:[%s2825_s11] ss:$28 sps:$4 sm:$0xff]  }
 0x11a   :  { %v1934_v35 = vpop.f32.mrb[7].mxu1 }
 0x11b   :  { %v706_v36 = vadd.f32 %v705_v27, %v665_v33  ;;  %v668_v37 = vadd.f32 %v1878_v34, %v627_v24  ;;  %v2094_v33 = vld [vmem:[%s2825_s11 + $0x38] ss:$28 sps:$4 sm:$0xff]   ;;  %v2100_v35 = vld [vmem:[%s2825_s11 + $0x70] ss:$28 sps:$4 sm:$0xff]  }
 0x11c   :  { %v2102_v34 = vld [vmem:[%s2825_s11 + $0x74] ss:$28 sps:$4 sm:$0xff]  }
 0x11d   :  { %v714_v39 = vmul.f32 0.01, %v706_v36  ;;  %v709_v40 = vadd.f32 %v708_v32, %v668_v37  ;;  %vm712_vm1 = vcmp.gt.f32.partialorder %v706_v36, 0.0  ;;  %v2096_v32 = vld [vmem:[%s2825_s11 + $0x3c] ss:$28 sps:$4 sm:$0xff]  }
 0x11e   :  { %v2106_v37 = vld [vmem:[%s2825_s11 + $0xa8] ss:$28 sps:$4 sm:$0xff]  }
 0x11f   :  { %vm713_vm2 = vcmp.gt.f32.partialorder %v709_v40, 0.0  ;;  %v715_v41 = vmul.f32 0.01, %v709_v40  ;;  %v716_v42 = vsel %vm712_vm1, %v706_v36, %v714_v39  ;;  %v2108_v36 = vld [vmem:[%s2825_s11 + $0xac] ss:$28 sps:$4 sm:$0xff]  }
 0x120   :  { %v2114_v39 = vld [vmem:[%s2825_s11 + $0xe4] ss:$28 sps:$4 sm:$0xff]  }
 0x121   :  { %v717_v43 = vsel %vm713_vm2, %v709_v40, %v715_v41  ;;  %v2112_v40 = vld [vmem:[%s2825_s11 + $0xe0] ss:$28 sps:$4 sm:$0xff]  }
 0x122   :  { %v718_v44 = vpack.c.bf16 %v717_v43, %v716_v42  ;;  %v2120_v41 = vld [vmem:[%s2825_s11 + $0x11c] ss:$28 sps:$4 sm:$0xff]   ;;  %v2126_v43 = vld [vmem:[%s2825_s11 + $0x154] ss:$28 sps:$4 sm:$0xff]  }
 0x123   :  { %v2118_v42 = vld [vmem:[%s2825_s11 + $0x118] ss:$28 sps:$4 sm:$0xff]  }
 0x124   :  { %1952 = vmatmul.mubr.bf16.vlgmr.msra.gmra.mrb[8].mxu0 %v718_v44  ;;  %v2129_v44 = vld [vmem:[%s2825_s11 + $0x15c] ss:$28 sps:$4 sm:$0xff]  }
 0x125   :  { %1486 = vmatpush1.bf16.msra.mxu0 %v2091_v0  ;;  %v2136_v0 = vld [vmem:[%s2825_s11 + $0x10] ss:$28 sps:$4 sm:$0xff]  }
 0x126   :  { %1487 = vmatprep.subr.bf16.mxu0 %v2099_v2 }
 0x129   :  { %1488 = vmatpush1.bf16.msra.mxu0 %v2097_v3  ;;  %v2142_v3 = vld [vmem:[%s2825_s11 + $0x4c] ss:$28 sps:$4 sm:$0xff]  }
 0x12a   :  { %1489 = vmatprep.subr.bf16.mxu0 %v2105_v4  ;;  %v2140_v4 = vld [vmem:[%s2825_s11 + $0x48] ss:$28 sps:$4 sm:$0xff]  }
 0x12d   :  { %1490 = vmatpush1.bf16.msra.mxu0 %v2103_v5  ;;  %v2143_v5 = vld [vmem:[%s2825_s11 + $0x50] ss:$28 sps:$4 sm:$0xff]  }
 0x12e   :  { %1491 = vmatprep.subr.bf16.mxu0 %v2111_v6  ;;  %v2146_v6 = vld [vmem:[%s2825_s11 + $0x84] ss:$28 sps:$4 sm:$0xff]  }
 0x131   :  { %1492 = vmatpush1.bf16.msra.mxu0 %v2109_v7  ;;  %v2144_v7 = vld [vmem:[%s2825_s11 + $0x80] ss:$28 sps:$4 sm:$0xff]  }
 0x132   :  { %1493 = vmatprep.subr.bf16.mxu0 %v2117_v8  ;;  %v2147_v8 = vld [vmem:[%s2825_s11 + $0x88] ss:$28 sps:$4 sm:$0xff]  }
 0x135   :  { %1494 = vmatpush1.bf16.msra.mxu0 %v2115_v9  ;;  %v2150_v9 = vld [vmem:[%s2825_s11 + $0xbc] ss:$28 sps:$4 sm:$0xff]  }
 0x136   :  { %1495 = vmatprep.subr.bf16.mxu0 %v2123_v10  ;;  %v2148_v10 = vld [vmem:[%s2825_s11 + $0xb8] ss:$28 sps:$4 sm:$0xff]  }
 0x139   :  { %1496 = vmatpush1.bf16.msra.mxu0 %v2121_v11  ;;  %v2151_v11 = vld [vmem:[%s2825_s11 + $0xc0] ss:$28 sps:$4 sm:$0xff]  }
 0x13a   :  { %1497 = vmatprep.subr.bf16.mxu0 %v2129_v44 }
 0x13d   :  { %1498 = vmatpush1.bf16.msra.mxu0 %v2127_v46 }
 0x1f7   :  { %v824_v48 = vpop.f32.mrb[8].mxu0 }
 0x1f8   :  { %v825_v49 = vadd.f32 %v1736_v47, %v824_v48  ;;  %v1953_v50 = vpop.f32.mrb[9].mxu0  ;;  %v2135_v48 = vld [vmem:[%s2825_s11 + $0x194] ss:$28 sps:$4 sm:$0xff]  }
 0x1f9   :  { %v827_v51 = vpop.f32.mrb[10].mxu0  ;;  %v2133_v50 = vld [vmem:[%s2825_s11 + $0x190] ss:$28 sps:$4 sm:$0xff]   ;;  %1499 = vmatprep.subr.bf16.mxu0 %v2135_v48 }
 0x1fa   :  { %v833_v52 = vmul.f32 0.01, %v825_v49  ;;  %v828_v53 = vadd.f32 %v1736_v47, %v827_v51  ;;  %v1954_v54 = vpop.f32.mrb[11].mxu0  ;;  %vm831_vm3 = vcmp.gt.f32.partialorder %v825_v49, 0.0  ;;  %v2132_v47 = vld [vmem:[%s2825_s11 + $0x18c] ss:$28 sps:$4 sm:$0xff]   ;;  %1500 = vmatpush1.bf16.msra.mxu0 %v2133_v50 }
 0x1fb   :  { %v2138_v51 = vld [vmem:[%s2825_s11 + $0x14] ss:$28 sps:$4 sm:$0xff]   ;;  %1979 = vmatprep.subr.bf16.mxu0 %v2244_v38 }
 0x1fc   :  { %vm832_vm4 = vcmp.gt.f32.partialorder %v828_v53, 0.0  ;;  %v834_v55 = vmul.f32 0.01, %v828_v53  ;;  %v835_v56 = vsel %vm831_vm3, %v825_v49, %v833_v52  ;;  %v2130_v49 = vld [vmem:[%s2825_s11 + $0x188] ss:$28 sps:$4 sm:$0xff]   ;;  %v2246_v52 = vmov 0  }
 0x1fd   :  { %1517 = vmatprep.mubr.bf16.mxu0 %v2246_v52 }
 0x1fe   :  { %v836_v57 = vsel %vm832_vm4, %v828_v53, %v834_v55  ;;  %v1753_v53 = vld [vmem:[%s2824_s10] ss:$0 sm:$0xff] }
 0x1ff   :  { %v837_v59 = vpack.c.bf16 %v836_v57, %v835_v56 }
 0x201   :  { %1960 = vmatmul.mubr.msk.bf16.vlgmr.msra.gmra.mrb[8].mxu1 %vm861_vm5, %v837_v59 }
 0x202   :  { %1964 = vmatpush3.bf16.msra.mxu1 %v2084_v58  ;;  %1967 = vmatprep.mubr.msk.bf16.mxu1 %vm2245_vm0, %v2244_v38 }
 0x203   :  { %1965 = vmatprep.subr.bf16.mxu1 %v2244_v38 }
 0x206   :  { %1966 = vmatpush3.bf16.msra.mxu1 %v2085_v60 }
 0x207   :  { %1971 = vmatprep.subr.bf16.mxu1 %v2244_v38 }
 0x209   :  { %1968 = vmatmul.mubr.msk.bf16.vlgmr.msra.gmra.mrb[12].mxu1 %vm861_vm5, %v837_v59 }
 0x20a   :  { %1975 = vmatprep.mubr.msk.bf16.mxu1 %vm2245_vm0, %v2244_v38  ;;  %1972 = vmatpush3.bf16.msra.mxu1 %v2086_v61 }
 0x20b   :  { %1973 = vmatprep.subr.bf16.mxu1 %v2244_v38 }
 0x20e   :  { %1974 = vmatpush3.bf16.msra.mxu1 %v2087_v62 }
 0x20f   :  { %1442 = vmatprep.subr.bf16.mxu1 %v2090_v63 }
 0x2d4   :  { %v899_v13 = vpop.f32.mrb[8].mxu1 }
 0x2d5   :  { %v900_v14 = vadd.f32 %v1745_v12, %v899_v13  ;;  %v1961_v15 = vpop.f32.mrb[9].mxu1  ;;  %v2152_v13 = vld [vmem:[%s2825_s11 + $0xf0] ss:$28 sps:$4 sm:$0xff]  }
 0x2d6   :  { %v902_v16 = vpop.f32.mrb[10].mxu1  ;;  %v2158_v15 = vld [vmem:[%s2825_s11 + $0x12c] ss:$28 sps:$4 sm:$0xff]  }
 0x2d7   :  { %906 = vst [vmem:[#allocation2] sm:$0xff] %v900_v14  ;;  %v903_v17 = vadd.f32 %v1745_v12, %v902_v16  ;;  %v1962_v18 = vpop.f32.mrb[11].mxu1  ;;  %v2154_v12 = vld [vmem:[%s2825_s11 + $0xf4] ss:$28 sps:$4 sm:$0xff]   ;;  %v2156_v16 = vld [vmem:[%s2825_s11 + $0x128] ss:$28 sps:$4 sm:$0xff]  }
 0x2d8   :  { %v2155_v14 = vld [vmem:[%s2825_s11 + $0xf8] ss:$28 sps:$4 sm:$0xff]   ;;  %v2162_v18 = vld [vmem:[%s2825_s11 + $0x164] ss:$28 sps:$4 sm:$0xff]  }
 0x2d9   :  { %907 = vst [vmem:[#allocation2 + $0x8] sm:$0xff] %v903_v17  ;;  %v2159_v17 = vld [vmem:[%s2825_s11 + $0x130] ss:$28 sps:$4 sm:$0xff]  }
 0x2dc   :  { %v965_v20 = vpop.f32.mrb[12].mxu1 }
 0x2dd   :  { %v966_v21 = vadd.f32 %v1749_v19, %v965_v20  ;;  %v1969_v22 = vpop.f32.mrb[13].mxu1  ;;  %v2163_v20 = vld [vmem:[%s2825_s11 + $0x168] ss:$28 sps:$4 sm:$0xff]  }
 0x2de   :  { %v968_v23 = vpop.f32.mrb[14].mxu1  ;;  %v2164_v22 = vld [vmem:[%s2825_s11 + $0x198] ss:$28 sps:$4 sm:$0xff]  }
 0x2df   :  { %v974_v24 = vmul.f32 0.01, %v966_v21  ;;  %v969_v25 = vadd.f32 %v1749_v19, %v968_v23  ;;  %v1970_v26 = vpop.f32.mrb[15].mxu1  ;;  %vm972_vm6 = vcmp.gt.f32.partialorder %v966_v21, 0.0  ;;  %v2160_v19 = vld [vmem:[%s2825_s11 + $0x160] ss:$28 sps:$4 sm:$0xff]  }
 0x2e0   :  { %v2167_v23 = vld [vmem:[%s2825_s11 + $0x1a0] ss:$28 sps:$4 sm:$0xff]  }
 0x2e1   :  { %vm973_vm7 = vcmp.gt.f32.partialorder %v969_v25, 0.0  ;;  %v975_v27 = vmul.f32 0.01, %v969_v25  ;;  %v976_v28 = vsel %vm972_vm6, %v966_v21, %v974_v24  ;;  %v2166_v21 = vld [vmem:[%s2825_s11 + $0x19c] ss:$28 sps:$4 sm:$0xff]  }
 0x2e3   :  { %v977_v29 = vsel %vm973_vm7, %v969_v25, %v975_v27 }
 0x2e4   :  { %v978_v31 = vpack.c.bf16 %v977_v29, %v976_v28 }
 0x2e6   :  { %1976 = vmatmul.mubr.msk.bf16.vlgmr.msra.gmra.mrb[16].mxu1 %vm861_vm5, %v978_v31 }
 0x2e7   :  { %1443 = vmatpush1.bf16.msra.mxu1 %v2088_v30  ;;  %1474 = vmatprep.mubr.bf16.mxu1 %v2246_v52 }
 0x2e8   :  { %1444 = vmatprep.subr.bf16.mxu1 %v2096_v32 }
 0x2eb   :  { %1445 = vmatpush1.bf16.msra.mxu1 %v2094_v33 }
 0x2ec   :  { %1446 = vmatprep.subr.bf16.mxu1 %v2102_v34 }
 0x2ef   :  { %1447 = vmatpush1.bf16.msra.mxu1 %v2100_v35 }
 0x2f0   :  { %1448 = vmatprep.subr.bf16.mxu1 %v2108_v36 }
 0x2f3   :  { %1449 = vmatpush1.bf16.msra.mxu1 %v2106_v37 }
 0x2f4   :  { %1450 = vmatprep.subr.bf16.mxu1 %v2114_v39 }
 0x2f7   :  { %1451 = vmatpush1.bf16.msra.mxu1 %v2112_v40 }
 0x2f8   :  { %1452 = vmatprep.subr.bf16.mxu1 %v2120_v41 }
 0x2fb   :  { %1453 = vmatpush1.bf16.msra.mxu1 %v2118_v42 }
 0x2fc   :  { %1454 = vmatprep.subr.bf16.mxu1 %v2126_v43 }
 0x2ff   :  { %1455 = vmatpush1.bf16.msra.mxu1 %v2124_v45 }
 0x300   :  { %1456 = vmatprep.subr.bf16.mxu1 %v2132_v47 }
 0x303   :  { %1457 = vmatpush1.bf16.msra.mxu1 %v2130_v49 }
 0x304   :  { %1528 = vmatprep.subr.bf16.mxu1 %v2138_v51 }
 0x3b9   :  { %v1039_v54 = vpop.f32.mrb[16].mxu1 }
 0x3ba   :  { %v1040_v55 = vadd.f32 %v1753_v53, %v1039_v54  ;;  %v1977_v56 = vpop.f32.mrb[17].mxu1 }
 0x3bb   :  { %v1042_v57 = vpop.f32.mrb[18].mxu1 }
 0x3bc   :  { %v1048_v58 = vmul.f32 0.01, %v1040_v55  ;;  %v1043_v59 = vadd.f32 %v1753_v53, %v1042_v57  ;;  %v1978_v60 = vpop.f32.mrb[19].mxu1  ;;  %vm1046_vm8 = vcmp.gt.f32.partialorder %v1040_v55, 0.0 }
 0x3be   :  { %vm1047_vm9 = vcmp.gt.f32.partialorder %v1043_v59, 0.0  ;;  %v1049_v61 = vmul.f32 0.01, %v1043_v59  ;;  %v1050_v62 = vsel %vm1046_vm8, %v1040_v55, %v1048_v58 }
 0x3c0   :  { %v1051_v63 = vsel %vm1047_vm9, %v1043_v59, %v1049_v61 }
 0x3c1   :  { %v1052_v2 = vpack.c.bf16 %v1051_v63, %v1050_v62 }
 0x3c3   :  { %1475 = vmatmul.mubr.bf16.vlgmr.msra.gmra.mrb[20].mxu1 %v1052_v2  ;;  %1518 = vmatmul.mubr.bf16.vlgmr.msra.gmra.mrb[12].mxu0 %v1052_v2 }
 0x3c4   :  { %1529 = vmatpush1.bf16.msra.mxu1 %v2136_v0  ;;  %1980 = vmatpush3.bf16.msra.mxu0 %v2139_v1 }
 0x3c5   :  { %1530 = vmatprep.subr.bf16.mxu1 %v2142_v3  ;;  %1981 = vmatprep.subr.bf16.mxu0 %v2244_v38 }
 0x3c6   :  { %1560 = vmatprep.mubr.bf16.mxu1 %v2246_v52  ;;  %1995 = vmatprep.mubr.msk.bf16.mxu0 %vm2245_vm0, %v2244_v38 }
 0x3c8   :  { %1531 = vmatpush1.bf16.msra.mxu1 %v2140_v4  ;;  %1982 = vmatpush3.bf16.msra.mxu0 %v2143_v5 }
 0x3c9   :  { %1532 = vmatprep.subr.bf16.mxu1 %v2146_v6  ;;  %1983 = vmatprep.subr.bf16.mxu0 %v2244_v38 }
 0x3cc   :  { %1533 = vmatpush1.bf16.msra.mxu1 %v2144_v7  ;;  %1984 = vmatpush3.bf16.msra.mxu0 %v2147_v8 }
 0x3cd   :  { %1534 = vmatprep.subr.bf16.mxu1 %v2150_v9  ;;  %1985 = vmatprep.subr.bf16.mxu0 %v2244_v38 }
 0x3d0   :  { %1535 = vmatpush1.bf16.msra.mxu1 %v2148_v10  ;;  %1986 = vmatpush3.bf16.msra.mxu0 %v2151_v11 }
 0x3d1   :  { %1536 = vmatprep.subr.bf16.mxu1 %v2154_v12  ;;  %1987 = vmatprep.subr.bf16.mxu0 %v2244_v38 }
 0x3d4   :  { %1537 = vmatpush1.bf16.msra.mxu1 %v2152_v13  ;;  %1988 = vmatpush3.bf16.msra.mxu0 %v2155_v14 }
 0x3d5   :  { %1538 = vmatprep.subr.bf16.mxu1 %v2158_v15  ;;  %1989 = vmatprep.subr.bf16.mxu0 %v2244_v38 }
 0x3d8   :  { %1539 = vmatpush1.bf16.msra.mxu1 %v2156_v16  ;;  %1990 = vmatpush3.bf16.msra.mxu0 %v2159_v17 }
 0x3d9   :  { %1540 = vmatprep.subr.bf16.mxu1 %v2162_v18  ;;  %1991 = vmatprep.subr.bf16.mxu0 %v2244_v38 }
 0x3dc   :  { %1541 = vmatpush1.bf16.msra.mxu1 %v2160_v19  ;;  %1992 = vmatpush3.bf16.msra.mxu0 %v2163_v20 }
 0x3dd   :  { %1542 = vmatprep.subr.bf16.mxu1 %v2166_v21  ;;  %1993 = vmatprep.subr.bf16.mxu0 %v2244_v38 }
 0x3e0   :  { %1543 = vmatpush1.bf16.msra.mxu1 %v2164_v22  ;;  %1994 = vmatpush3.bf16.msra.mxu0 %v2167_v23 }
 0x3e3   :  { %1561 = vmatmul.mubr.bf16.vlgmr.msra.gmra.mrb[24].mxu1 %v1052_v2  ;;  %1996 = vmatmul.mubr.bf16.vlgmr.msra.gmra.mrb[16].mxu0 %v1052_v2 }
 0x3e4   :  { %2207 = shalt.err (!%p2204_p4)
}
 0x3e5   :  { %s2208_s11 = scalar_lea.hbm %s2827_s13, 256 }
 0x3e6   :  { %p2209_p5 = scmp.ne.s32.totalorder %s2827_s13, %s2208_s11  ;;  %p2212_p6 = scmp.lt.u32.totalorder %s2208_s11, %s2827_s13 }
 0x3e8   :  { %p2214_p7 = pnand %p2212_p6, %p2209_p5 }
 0x3ea   :  { %2217 = shalt.err (!%p2214_p7)
}
 0x3eb   :  { %s2248_s16 = smov 128   ;;  %s2249_s7 = smov 8   ;;  %v1119_v38 = vlaneseq  ;;  %v1117_v27 = vld [vmem:[%s2826_s12] sm:$0xff] }
 0x3ec   :  { %1651 = dma.vmem_to_hbm [thread:$0]  %s1646_s27, 256, %s2827_s13, [#allocation3], %s2248_s16, %s2248_s16, %s2249_s7  }
 0x3ed   :  { %v1120_v24 = vshrl.u32 %v1119_v38, 7  ;;  %s2250_s12 = smov [#allocation4]  }
 0x3ee   :  { %s1657_s13 = sshll.u32 %s2250_s12, 4  ;;  %s1658_s13 = int_to_ptr.vmem [resolvable:$true] %s1657_s13 }
 0x3ef   :  { %v1121_v25 = vsub.s32 0, %v1120_v24  ;;  %v1129_v26 = vsub.s32 2, %v1120_v24  ;;  %v1125_v28 = vsub.s32 1, %v1120_v24  ;;  %v1133_v29 = vsub.s32 3, %v1120_v24  ;;  %s2218_s20 = scalar_lea.vmem %s1658_s13, 1792  ;;  %p2223_p9 = scmp.lt.s32.totalorder %s1658_s13, %s1658_s13 }
 0x3f0   :  { %v1137_v59 = vsub.s32 4, %v1120_v24  ;;  %v1145_v60 = vsub.s32 6, %v1120_v24  ;;  %v1141_v61 = vsub.s32 5, %v1120_v24  ;;  %p2219_p8 = scmp.ne.s32.totalorder %s1658_s13, %s2218_s20  ;;  %p2224_p10 = scmp.lt.s32.totalorder %s2218_s20, %s2218_s20 }
 0x3f1   :  { %v1122_v30 = vrot.slane %v1117_v27, %v1121_v25  ;;  %v1130_v31 = vrot.slane %v1117_v27, %v1129_v26  ;;  %v1126_v32 = vrot.slane %v1117_v27, %v1125_v28  ;;  %v1134_v33 = vrot.slane %v1117_v27, %v1133_v29 }
 0x3f2   :  { %v1138_v62 = vrot.slane %v1117_v27, %v1137_v59  ;;  %v1146_v63 = vrot.slane %v1117_v27, %v1145_v60  ;;  %v1142_v0 = vrot.slane %v1117_v27, %v1141_v61  ;;  %p2225_p11 = por %p2224_p10, %p2223_p9 }
 0x3f4   :  { %p2226_p12 = pnand %p2225_p11, %p2219_p8 }
 0x496   :  { %v1476_v34 = vpop.f32.mrb[20].mxu1  ;;  %v1519_v35 = vpop.f32.mrb[12].mxu0 }
 0x497   :  { %v1477_v36 = vadd.f32 %v1476_v34, %v1122_v30  ;;  %v1520_v37 = vadd.f32 %v1519_v35, %v1130_v31  ;;  %v1478_v39 = vpop.f32.mrb[21].mxu1  ;;  %v1521_v40 = vpop.f32.mrb[13].mxu0 }
 0x498   :  { %v1479_v41 = vadd.f32 %v1478_v39, %v1126_v32  ;;  %v1522_v42 = vadd.f32 %v1521_v40, %v1134_v33  ;;  %v1480_v43 = vpop.f32.mrb[22].mxu1  ;;  %v1523_v44 = vpop.f32.mrb[14].mxu0 }
 0x499   :  { %2168 = vtanh.f32 %v1477_v36  ;;  %v1481_v45 = vadd.f32 %v1480_v43, %v1122_v30  ;;  %v1482_v46 = vpop.f32.mrb[23].mxu1  ;;  %v1525_v47 = vpop.f32.mrb[15].mxu0  ;;  %v1524_v48 = vadd.f32 %v1523_v44, %v1130_v31 }
 0x49a   :  { %2170 = vtanh.f32 %v1520_v37  ;;  %v1483_v49 = vadd.f32 %v1482_v46, %v1126_v32  ;;  %v1526_v50 = vadd.f32 %v1525_v47, %v1134_v33 }
 0x49b   :  { %2172 = vtanh.f32 %v1479_v41 }
 0x49c   :  { %2174 = vtanh.f32 %v1522_v42 }
 0x49d   :  { %2176 = vtanh.f32 %v1481_v45 }
 0x49e   :  { %2178 = vtanh.f32 %v1524_v48 }
 0x49f   :  { %2180 = vtanh.f32 %v1483_v49 }
 0x4a0   :  { %2182 = vtanh.f32 %v1526_v50 }
 0x4a3   :  { %v2169_v51 = vpop.eup %2168 }
 0x4a4   :  { %v2171_v52 = vpop.eup %2170  ;;  %1626 = vst [vmem:[#allocation4] sm:$0xff] %v2169_v51 }
 0x4a5   :  { %v2173_v53 = vpop.eup %2172  ;;  %1628 = vst [vmem:[#allocation4 + $0x10] sm:$0xff] %v2171_v52 }
 0x4a6   :  { %v2175_v54 = vpop.eup %2174  ;;  %1627 = vst [vmem:[#allocation4 + $0x8] sm:$0xff] %v2173_v53 }
 0x4a7   :  { %v2177_v55 = vpop.eup %2176  ;;  %1629 = vst [vmem:[#allocation4 + $0x18] sm:$0xff] %v2175_v54 }
 0x4a8   :  { %v2179_v56 = vpop.eup %2178  ;;  %1633 = vst [vmem:[#allocation4 + $0x38] sm:$0xff] %v2177_v55 }
 0x4a9   :  { %v2181_v57 = vpop.eup %2180  ;;  %1635 = vst [vmem:[#allocation4 + $0x48] sm:$0xff] %v2179_v56 }
 0x4aa   :  { %v2183_v58 = vpop.eup %2182  ;;  %1634 = vst [vmem:[#allocation4 + $0x40] sm:$0xff] %v2181_v57 }
 0x4ab   :  { %1636 = vst [vmem:[#allocation4 + $0x50] sm:$0xff] %v2183_v58 }
 0x4b6   :  { %v1562_v1 = vpop.f32.mrb[24].mxu1  ;;  %v1605_v2 = vpop.f32.mrb[16].mxu0 }
 0x4b7   :  { %v1563_v3 = vadd.f32 %v1562_v1, %v1138_v62  ;;  %v1606_v4 = vadd.f32 %v1605_v2, %v1146_v63  ;;  %v1564_v5 = vpop.f32.mrb[25].mxu1  ;;  %v1997_v6 = vpop.f32.mrb[17].mxu0 }
 0x4b8   :  { %v1565_v7 = vadd.f32 %v1564_v5, %v1142_v0  ;;  %v1566_v8 = vpop.f32.mrb[26].mxu1  ;;  %v1608_v9 = vpop.f32.mrb[18].mxu0 }
 0x4b9   :  { %2184 = vtanh.f32 %v1563_v3  ;;  %v1567_v10 = vadd.f32 %v1566_v8, %v1138_v62  ;;  %v1609_v11 = vadd.f32 %v1608_v9, %v1146_v63  ;;  %v1568_v12 = vpop.f32.mrb[27].mxu1  ;;  %v1998_v13 = vpop.f32.mrb[19].mxu0 }
 0x4ba   :  { %2186 = vtanh.f32 %v1606_v4  ;;  %v1569_v14 = vadd.f32 %v1568_v12, %v1142_v0 }
 0x4bb   :  { %2188 = vtanh.f32 %v1565_v7 }
 0x4bc   :  { %2190 = vtanh.f32 %v1567_v10 }
 0x4bd   :  { %2192 = vtanh.f32 %v1609_v11 }
 0x4be   :  { %2194 = vtanh.f32 %v1569_v14 }
 0x4c3   :  { %v2185_v15 = vpop.eup %2184 }
 0x4c4   :  { %v2187_v16 = vpop.eup %2186  ;;  %1630 = vst [vmem:[#allocation4 + $0x20] sm:$0xff] %v2185_v15 }
 0x4c5   :  { %v2189_v17 = vpop.eup %2188  ;;  %1632 = vst [vmem:[#allocation4 + $0x30] sm:$0xff] %v2187_v16 }
 0x4c6   :  { %v2191_v18 = vpop.eup %2190  ;;  %1631 = vst [vmem:[#allocation4 + $0x28] sm:$0xff] %v2189_v17 }
 0x4c7   :  { %v2193_v19 = vpop.eup %2192  ;;  %1637 = vst [vmem:[#allocation4 + $0x58] sm:$0xff] %v2191_v18 }
 0x4c8   :  { %v2195_v20 = vpop.eup %2194  ;;  %1639 = vst [vmem:[#allocation4 + $0x68] sm:$0xff] %v2193_v19 }
 0x4c9   :  { %1638 = vst [vmem:[#allocation4 + $0x60] sm:$0xff] %v2195_v20 }
 0x4ca   :  { %2229 = shalt.err (!%p2226_p12)
}
 0x4cb   :  { %s2230_s23 = scalar_lea.hbm %s2828_s14, 1792 }
 0x4cc   :  { %p2231_p13 = scmp.ne.s32.totalorder %s2828_s14, %s2230_s23  ;;  %p2234_p0 = scmp.lt.u32.totalorder %s2230_s23, %s2828_s14 }
 0x4ce   :  { %p2236_p1 = pnand %p2234_p0, %p2231_p13 }
 0x4d0   :  { %2239 = shalt.err (!%p2236_p1)
}
 0x4d1   :  { %s2251_s8 = smov 896   ;;  %s2252_s26 = smov 56  }
 0x4d2   :  { %1663 = dma.vmem_to_hbm [thread:$0]  %s1658_s13, 1792, %s2828_s14, [#allocation5], %s2251_s8, %s2251_s8, %s2252_s26  }
 0x4d3   :  { %2240 = dma.done.wait [#allocation3], 256  }
 0x4d4   :  { %2241 = vsyncadd [#allocation3], 4294967040 }
 0x4d5   :  { %2242 = dma.done.wait [#allocation5], 1792  }
 0x4d6   :  { %2243 = vsyncadd [#allocation5], 4294965504 }
 0x4d7   :  { %1670 = vsyncpa [#allocation3], 1 }
 0x4d8   :  { %1671 = vsyncpa [#allocation5], 1 }

</bundles_post_ra>
